<compile_context>
chip_gen: v6e
topology: v6e:2x2x1
jax: 0.10.0
libtpu: 0.0.40
codegen_flags: <defaults>
</compile_context>

<pallas_src>
import jax
import jax.numpy as jnp
from jax.experimental import pallas as pl
from jax.experimental.pallas import tpu as pltpu


def _round_up(v, m):
    return (v + m - 1) // m * m


def _choose_token_tile(n_tokens, lanes, feat, budget_bytes=24 * 1024 * 1024):
    """Token-tile size that keeps resident weights + double-buffered token
    tiles well inside the scoped-VMEM budget (conservative enough for v7x)."""
    resident = 2 * lanes * feat * 2 + (2 * feat + lanes) * 4      # bf16 W_e/W_d + f32 vectors
    per_tok = 2 * 4 * (2 * lanes + 2) + 4 * feat                  # dbl-buffered in/out rows + z
    tn = (budget_bytes - resident) // max(per_tok, 1)
    tn = int(max(8, min(tn, 1024)))
    tn = min(tn, _round_up(n_tokens, 8))
    return max(8, (tn // 8) * 8)


# ----------------------------------------------------------------------------
# Fused kernel: encoder (patch-embed + mask token) + decoder (1x1 conv) +
#               masked-L1 numerator row sums.
# ----------------------------------------------------------------------------
def _simmim_fused_kernel(patches_ref, mask_ref, we_ref, be_ref, mtok_ref,
                         wd_ref, bd_ref, out_ref, l1_ref):
    x_p = patches_ref[...]                       # (TN, PL) f32 target patches
    m = mask_ref[...]                            # (TN, 1)  f32 {0, 1}

    # encoder: patch embedding (conv pxp / stride p as an MXU matmul, bf16 ops)
    z = jnp.dot(x_p.astype(jnp.bfloat16), we_ref[...],
                preferred_element_type=jnp.float32) + be_ref[...]
    # SimMIM masked patch embedding: masked tokens -> learnable mask token
    z = jnp.where(m != 0.0, mtok_ref[...], z)
    # decoder nn.Conv2d(kernel_size=1): per-token MXU matmul + bias
    y = jnp.dot(z.astype(jnp.bfloat16), wd_ref[...],
                preferred_element_type=jnp.float32) + bd_ref[...]
    out_ref[...] = y                             # lane-dense (TN, PL) store

    # fused masked-L1 numerator.  Valid because patch_size == encoder_stride:
    # the target patch and the decoder output share the (c, ph, pw) element
    # order, and zero-padded lanes / padded tokens contribute exactly 0.
    l1_ref[...] = m * jnp.sum(jnp.abs(x_p - y), axis=-1, keepdims=True)


# ----------------------------------------------------------------------------
# Wrapper
# ----------------------------------------------------------------------------
def simmim_forward(x, mask, params, *, patch_size, encoder_stride, in_chans):
    B, C, H, W = x.shape
    p, r = patch_size, encoder_stride
    # The fused masked-L1 path requires the standard SimMIM geometry.
    assert p == r and in_chans == 3 and C == in_chans, \
        "fused loss requires patch_size == encoder_stride and 3 channels"
    Hp, Wp = H // p, W // p
    F = params["w_embed"].shape[1]
    P = C * p * p
    c_out = r * r * 3                 # == P for this geometry
    N = B * Hp * Wp

    PL = _round_up(max(P, c_out), 128)           # lane-dense channel dim
    TN = _choose_token_tile(N, PL, F)
    N_pad = _round_up(N, TN)
    n_tiles = N_pad // TN

    # glue: non-overlapping patch extraction, (c, ph, pw) channel ordering
    # (matches the PyTorch conv weight (F, C, p, p) flattening).
    patches = x.reshape(B, C, Hp, p, Wp, p).transpose(0, 2, 4, 1, 3, 5)
    patches = patches.reshape(N, P).astype(jnp.float32)
    patches = jnp.pad(patches, ((0, N_pad - N), (0, PL - P)))
    mask_tok = jnp.pad(mask.reshape(N, 1).astype(jnp.float32),
                       ((0, N_pad - N), (0, 0)))

    # weights: zero-pad to the lane-dense size, bf16 for MXU operands.
    w_e = jnp.pad(params["w_embed"].astype(jnp.float32),
                  ((0, PL - P), (0, 0))).astype(jnp.bfloat16)        # (PL, F)
    b_e = params["b_embed"].astype(jnp.float32)                      # (1, F)
    mtok = params["mask_token"].astype(jnp.float32)                  # (1, F)
    w_d = jnp.pad(params["w_dec"].astype(jnp.float32),
                  ((0, 0), (0, PL - c_out))).astype(jnp.bfloat16)    # (F, PL)
    b_d = jnp.pad(params["b_dec"].astype(jnp.float32),
                  ((0, 0), (0, PL - c_out)))                         # (1, PL)

    y_full, l1_rows = pl.pallas_call(
        _simmim_fused_kernel,
        out_shape=(jax.ShapeDtypeStruct((N_pad, PL), jnp.float32),
                   jax.ShapeDtypeStruct((N_pad, 1), jnp.float32)),
        grid=(n_tiles,),
        in_specs=[
            pl.BlockSpec((TN, PL), lambda i: (i, 0)),    # patches (streamed)
            pl.BlockSpec((TN, 1), lambda i: (i, 0)),     # per-token mask
            pl.BlockSpec((PL, F), lambda i: (0, 0)),     # W_embed (resident)
            pl.BlockSpec((1, F), lambda i: (0, 0)),      # b_embed
            pl.BlockSpec((1, F), lambda i: (0, 0)),      # mask token
            pl.BlockSpec((F, PL), lambda i: (0, 0)),     # W_dec (resident)
            pl.BlockSpec((1, PL), lambda i: (0, 0)),     # b_dec
        ],
        out_specs=(pl.BlockSpec((TN, PL), lambda i: (i, 0)),
                   pl.BlockSpec((TN, 1), lambda i: (i, 0))),
        compiler_params=pltpu.CompilerParams(
            dimension_semantics=("parallel",),
            vmem_limit_bytes=32 * 1024 * 1024),
    )(patches, mask_tok, w_e, b_e, mtok, w_d, b_d)

    # glue: drop padding + PixelShuffle(r): (B, 3*r*r, Hp, Wp) -> (B, 3, H, W)
    y_tok = y_full[:N, :c_out].reshape(B, Hp, Wp, 3, r, r)
    x_rec = y_tok.transpose(0, 3, 1, 4, 2, 5).reshape(B, 3, Hp * r, Wp * r)

    # masked L1: numerator from fused per-token row sums (padded rows are 0),
    # denominator is just sum(mask) * p * p (mask_up has a single channel).
    num = jnp.sum(l1_rows)
    den = jnp.sum(mask.astype(jnp.float32)) * (p * p)
    loss = num / (den + 1e-5) / in_chans
    return loss, x_rec


# ----------------------------------------------------------------------------
# Pure-JAX reference (same math / same bf16 MXU operands) for correctness.
# ----------------------------------------------------------------------------
def simmim_reference(x, mask, params, *, patch_size, encoder_stride, in_chans):
    B, C, H, W = x.shape
    p, r = patch_size, encoder_stride
    Hp, Wp = H // p, W // p
    N = B * Hp * Wp
    c_out = r * r * 3
    patches = x.reshape(B, C, Hp, p, Wp, p).transpose(0, 2, 4, 1, 3, 5)
    patches = patches.reshape(N, C * p * p).astype(jnp.float32)
    z = jnp.dot(patches.astype(jnp.bfloat16),
                params["w_embed"].astype(jnp.bfloat16),
                preferred_element_type=jnp.float32) + params["b_embed"]
    m = mask.reshape(N, 1).astype(jnp.float32)
    z = jnp.where(m != 0.0, params["mask_token"], z)
    y = jnp.dot(z.astype(jnp.bfloat16),
                params["w_dec"].astype(jnp.bfloat16),
                preferred_element_type=jnp.float32) + params["b_dec"]
    y = y.reshape(B, Hp, Wp, 3, r, r).transpose(0, 3, 1, 4, 2, 5)
    x_rec = y.reshape(B, 3, Hp * r, Wp * r)
    mask_up = jnp.repeat(jnp.repeat(mask, p, axis=1), p, axis=2)[:, None]
    mask_up = mask_up.astype(jnp.float32)
    l1 = jnp.abs(x.astype(jnp.float32) - x_rec) * mask_up
    loss = l1.sum() / (mask_up.sum() + 1e-5) / in_chans
    return loss, x_rec


if __name__ == "__main__":
    # Small, SimMIM-consistent shapes.
    B, in_chans, H, W = 2, 3, 16, 16
    patch_size = 4
    encoder_stride = 4          # == patch_size for this synthetic encoder
    num_features = 32
    Hp, Wp = H // patch_size, W // patch_size
    P = in_chans * patch_size * patch_size
    c_out = encoder_stride ** 2 * 3

    key = jax.random.PRNGKey(0)
    kx, km, k1, k2, k3, k4, k5 = jax.random.split(key, 7)

    x = jax.random.normal(kx, (B, in_chans, H, W), dtype=jnp.float32)
    mask = jax.random.bernoulli(km, 0.5, (B, Hp, Wp)).astype(jnp.float32)

    params = {
        "w_embed":    0.02 * jax.random.normal(k1, (P, num_features), jnp.float32),
        "b_embed":    0.01 * jax.random.normal(k2, (1, num_features), jnp.float32),
        "mask_token": 0.02 * jax.random.normal(k3, (1, num_features), jnp.float32),
        "w_dec":      0.02 * jax.random.normal(k4, (num_features, c_out), jnp.float32),
        "b_dec":      0.01 * jax.random.normal(k5, (1, c_out), jnp.float32),
    }

    loss, x_rec = simmim_forward(
        x, mask, params,
        patch_size=patch_size, encoder_stride=encoder_stride, in_chans=in_chans)
    loss = jax.block_until_ready(loss)
    x_rec = jax.block_until_ready(x_rec)

    loss_ref, x_rec_ref = simmim_reference(
        x, mask, params,
        patch_size=patch_size, encoder_stride=encoder_stride, in_chans=in_chans)

    assert x_rec.shape == x.shape
    assert jnp.allclose(x_rec, x_rec_ref, rtol=1e-4, atol=1e-4), "x_rec mismatch"
    assert jnp.allclose(loss, loss_ref, rtol=1e-4, atol=1e-4), (loss, loss_ref)
    print("KERNEL_OK")
</pallas_src>

<mosaic_0001>
module attributes {stable_mosaic.version = 11 : i64} {
  func.func @_simmim_fused_kernel(%arg0: i32, %arg1: memref<32x128xf32, #tpu.memory_space<vmem>>, %arg2: memref<32x1xf32, #tpu.memory_space<vmem>>, %arg3: memref<128x32xbf16, #tpu.memory_space<vmem>>, %arg4: memref<1x32xf32, #tpu.memory_space<vmem>>, %arg5: memref<1x32xf32, #tpu.memory_space<vmem>>, %arg6: memref<32x128xbf16, #tpu.memory_space<vmem>>, %arg7: memref<1x128xf32, #tpu.memory_space<vmem>>, %arg8: memref<32x128xf32, #tpu.memory_space<vmem>>, %arg9: memref<32x1xf32, #tpu.memory_space<vmem>>) attributes {dimension_semantics = [#tpu.dimension_semantics<parallel>], iteration_bounds = array<i64: 1>, scalar_prefetch = 0 : i64, scratch_operands = 0 : i64, tpu.core_type = #tpu.core_type<tc>, window_params = [{transform_indices = @transform_0, window_bounds = array<i64: 32, 128>}, {transform_indices = @transform_1, window_bounds = array<i64: 32, 1>}, {pipeline_mode = #tpu.pipeline_mode<synchronous>, transform_indices = @transform_2, window_bounds = array<i64: 128, 32>}, {pipeline_mode = #tpu.pipeline_mode<synchronous>, transform_indices = @transform_3, window_bounds = array<i64: 1, 32>}, {pipeline_mode = #tpu.pipeline_mode<synchronous>, transform_indices = @transform_4, window_bounds = array<i64: 1, 32>}, {pipeline_mode = #tpu.pipeline_mode<synchronous>, transform_indices = @transform_5, window_bounds = array<i64: 32, 128>}, {pipeline_mode = #tpu.pipeline_mode<synchronous>, transform_indices = @transform_6, window_bounds = array<i64: 1, 128>}, {transform_indices = @transform_7, window_bounds = array<i64: 32, 128>}, {transform_indices = @transform_8, window_bounds = array<i64: 32, 1>}]} {
    %c0 = arith.constant 0 : index
    %c0_0 = arith.constant 0 : index
    %0 = vector.load %arg1[%c0, %c0_0] : memref<32x128xf32, #tpu.memory_space<vmem>>, vector<32x128xf32>
    %c0_1 = arith.constant 0 : index
    %c0_2 = arith.constant 0 : index
    %1 = vector.load %arg2[%c0_1, %c0_2] : memref<32x1xf32, #tpu.memory_space<vmem>>, vector<32x1xf32>
    %2 = arith.truncf %0 : vector<32x128xf32> to vector<32x128xbf16>
    %c0_3 = arith.constant 0 : index
    %c0_4 = arith.constant 0 : index
    %3 = vector.load %arg3[%c0_3, %c0_4] : memref<128x32xbf16, #tpu.memory_space<vmem>>, vector<128x32xbf16>
    %cst = arith.constant dense<0.000000e+00> : vector<32x32xf32>
    %4 = tpu.matmul %2, %3, %cst {dimension_numbers = #tpu.dot_dimension_numbers<[1], [0], [0], [1], [0, 0, 1, 1], [], []>} : vector<32x128xbf16>, vector<128x32xbf16>, vector<32x32xf32> -> vector<32x32xf32>
    %c0_5 = arith.constant 0 : index
    %c0_6 = arith.constant 0 : index
    %5 = vector.load %arg4[%c0_5, %c0_6] : memref<1x32xf32, #tpu.memory_space<vmem>>, vector<1x32xf32>
    %6 = vector.broadcast %5 : vector<1x32xf32> to vector<32x32xf32>
    %7 = arith.addf %4, %6 : vector<32x32xf32>
    %cst_7 = arith.constant 0.000000e+00 : f32
    %8 = vector.broadcast %cst_7 : f32 to vector<32x1xf32>
    %9 = arith.cmpf one, %1, %8 : vector<32x1xf32>
    %c0_8 = arith.constant 0 : index
    %c0_9 = arith.constant 0 : index
    %10 = vector.load %arg5[%c0_8, %c0_9] : memref<1x32xf32, #tpu.memory_space<vmem>>, vector<1x32xf32>
    %11 = vector.shape_cast %9 : vector<32x1xi1> to vector<32x1xi1>
    %12 = vector.broadcast %11 : vector<32x1xi1> to vector<32x32xi1>
    %13 = vector.shape_cast %10 : vector<1x32xf32> to vector<1x32xf32>
    %14 = vector.broadcast %13 : vector<1x32xf32> to vector<32x32xf32>
    %15 = arith.select %12, %14, %7 : vector<32x32xi1>, vector<32x32xf32>
    %16 = arith.truncf %15 : vector<32x32xf32> to vector<32x32xbf16>
    %c0_10 = arith.constant 0 : index
    %c0_11 = arith.constant 0 : index
    %17 = vector.load %arg6[%c0_10, %c0_11] : memref<32x128xbf16, #tpu.memory_space<vmem>>, vector<32x128xbf16>
    %cst_12 = arith.constant dense<0.000000e+00> : vector<32x128xf32>
    %18 = tpu.matmul %16, %17, %cst_12 {dimension_numbers = #tpu.dot_dimension_numbers<[1], [0], [0], [1], [0, 0, 1, 1], [], []>} : vector<32x32xbf16>, vector<32x128xbf16>, vector<32x128xf32> -> vector<32x128xf32>
    %c0_13 = arith.constant 0 : index
    %c0_14 = arith.constant 0 : index
    %19 = vector.load %arg7[%c0_13, %c0_14] : memref<1x128xf32, #tpu.memory_space<vmem>>, vector<1x128xf32>
    %20 = vector.broadcast %19 : vector<1x128xf32> to vector<32x128xf32>
    %21 = arith.addf %18, %20 : vector<32x128xf32>
    %c0_15 = arith.constant 0 : index
    %c0_16 = arith.constant 0 : index
    %22 = vector.load %arg8[%c0_15, %c0_16] : memref<32x128xf32, #tpu.memory_space<vmem>>, vector<32x128xf32>
    tpu.vector_store %arg8[%c0_15, %c0_16], %21 {strides = array<i32>} : memref<32x128xf32, #tpu.memory_space<vmem>>, vector<32x128xf32>,
    %23 = arith.subf %0, %21 : vector<32x128xf32>
    %24 = math.absf %23 : vector<32x128xf32>
    %cst_17 = arith.constant dense<0.000000e+00> : vector<32xf32>
    %25 = vector.multi_reduction <add>, %24, %cst_17 [1] : vector<32x128xf32> to vector<32xf32>
    %26 = vector.shape_cast %25 : vector<32xf32> to vector<32x1xf32>
    %27 = arith.mulf %1, %26 : vector<32x1xf32>
    %c0_18 = arith.constant 0 : index
    %c0_19 = arith.constant 0 : index
    %28 = vector.load %arg9[%c0_18, %c0_19] : memref<32x1xf32, #tpu.memory_space<vmem>>, vector<32x1xf32>
    tpu.vector_store %arg9[%c0_18, %c0_19], %27 {strides = array<i32>} : memref<32x1xf32, #tpu.memory_space<vmem>>, vector<32x1xf32>,
    return
  }
  func.func @transform_0(%arg0: i32) -> (i32, i32) {
    %c0_i32 = arith.constant 0 : i32
    %c0_i32_0 = arith.constant 0 : i32
    return %arg0, %c0_i32 : i32, i32
  }
  func.func @transform_1(%arg0: i32) -> (i32, i32) {
    %c0_i32 = arith.constant 0 : i32
    %c0_i32_0 = arith.constant 0 : i32
    return %arg0, %c0_i32 : i32, i32
  }
  func.func @transform_2(%arg0: i32) -> (i32, i32) {
    %c0_i32 = arith.constant 0 : i32
    %c0_i32_0 = arith.constant 0 : i32
    %c0_i32_1 = arith.constant 0 : i32
    return %c0_i32, %c0_i32_0 : i32, i32
  }
  func.func @transform_3(%arg0: i32) -> (i32, i32) {
    %c0_i32 = arith.constant 0 : i32
    %c0_i32_0 = arith.constant 0 : i32
    %c0_i32_1 = arith.constant 0 : i32
    return %c0_i32, %c0_i32_0 : i32, i32
  }
  func.func @transform_4(%arg0: i32) -> (i32, i32) {
    %c0_i32 = arith.constant 0 : i32
    %c0_i32_0 = arith.constant 0 : i32
    %c0_i32_1 = arith.constant 0 : i32
    return %c0_i32, %c0_i32_0 : i32, i32
  }
  func.func @transform_5(%arg0: i32) -> (i32, i32) {
    %c0_i32 = arith.constant 0 : i32
    %c0_i32_0 = arith.constant 0 : i32
    %c0_i32_1 = arith.constant 0 : i32
    return %c0_i32, %c0_i32_0 : i32, i32
  }
  func.func @transform_6(%arg0: i32) -> (i32, i32) {
    %c0_i32 = arith.constant 0 : i32
    %c0_i32_0 = arith.constant 0 : i32
    %c0_i32_1 = arith.constant 0 : i32
    return %c0_i32, %c0_i32_0 : i32, i32
  }
  func.func @transform_7(%arg0: i32) -> (i32, i32) {
    %c0_i32 = arith.constant 0 : i32
    %c0_i32_0 = arith.constant 0 : i32
    return %arg0, %c0_i32 : i32, i32
  }
  func.func @transform_8(%arg0: i32) -> (i32, i32) {
    %c0_i32 = arith.constant 0 : i32
    %c0_i32_0 = arith.constant 0 : i32
    return %arg0, %c0_i32 : i32, i32
  }
}

</mosaic_0001>

<bundles_post_ra>
// kernel: tpu_custom_call.1
= control target key start
LH: loop header
LB: loop body
LE: loop exit
PB: predicated region body
PF: predicated region fallthrough
CT: control target
= control target key end

     0   :  { %v420_v2 = vmov 0   ;;  %s571_s0 = inlined_call_operand.vmem [shape: f32[32,128], index: 0, kind: input, shape index: {}]   ;;  %s572_s1 = inlined_call_operand.vmem [shape: f32[32,1], index: 1, kind: input, shape index: {}]   ;;  %s573_s2 = inlined_call_operand.vmem [shape: bf16[128,32], index: 2, kind: input, shape index: {}]   ;;  %s574_s3 = inlined_call_operand.vmem [shape: f32[1,32], index: 3, kind: input, shape index: {}]   ;;  %s575_s4 = inlined_call_operand.vmem [shape: f32[1,32], index: 4, kind: input, shape index: {}]   ;;  %s576_s5 = inlined_call_operand.vmem [shape: bf16[32,128], index: 5, kind: input, shape index: {}]   ;;  %s577_s6 = inlined_call_operand.vmem [shape: f32[1,128], index: 6, kind: input, shape index: {}]   ;;  %s578_s7 = inlined_call_operand.hbm [shape: f32[32,128], index: 7, kind: output, shape index: {0}]   ;;  %s579_s8 = inlined_call_operand.vmem [shape: f32[32,1], index: 8, kind: output, shape index: {1}]  }
   0x1   :  { %v388_v0 = vld [vmem:[%s573_s2 + $0x38] sm:$0xff]   ;;  %v389_v1 = vld [vmem:[%s573_s2 + $0x30] sm:$0xff]   ;;  %386 = vset.pattern.permute.xlu0 %v420_v2  ;;  %387 = vset.pattern.permute.xlu1 %v420_v2  ;;  %v390_v3 = vld [vmem:[%s573_s2 + $0x28] sm:$0xff]  }
   0x2   :  { %354 = vmatprep.subr.bf16.mxu0 %v388_v0  ;;  %v391_v4 = vld [vmem:[%s573_s2 + $0x20] sm:$0xff]   ;;  %v489_v6 = vld [vmem:[%s571_s0 + $0x8] sm:$0xff]  ;;  %v501_v9 = vld [vmem:[%s572_s1 + $0x10] sm:$0xff] }
   0x3   :  { %355 = vmatpush3.bf16.msra.mxu0 %v388_v0  ;;  %v484_v5 = vld [vmem:[%s571_s0] sm:$0xff]  ;;  %vm162_vm1 = vcmp.ne.f32.partialorder %v501_v9, 0.0  ;;  %v508_v10 = vld [vmem:[%s572_s1 + $0x8] sm:$0xff]  ;;  %v513_v11 = vld [vmem:[%s572_s1 + $0x18] sm:$0xff] }
   0x4   :  { %356 = vmatprep.subr.bf16.mxu0 %v389_v1  ;;  %v38_v7 = vpack.c.bf16 %v489_v6, %v484_v5  ;;  %v496_v8 = vld [vmem:[%s572_s1] sm:$0xff]  ;;  %v167_v13 = vsel %vm162_vm1, 1, %v420_v2  ;;  %vm161_vm2 = vcmp.ne.f32.partialorder %v508_v10, 0.0  ;;  %vm163_vm3 = vcmp.ne.f32.partialorder %v513_v11, 0.0  ;;  %v392_v14 = vld [vmem:[%s573_s2 + $0x18] sm:$0xff]  }
   0x5   :  { %vm160_vm0 = vcmp.ne.f32.partialorder %v496_v8, 0.0  ;;  %176 = vperm.xlu1 %387, %v167_v13   ;;  %v166_v15 = vsel %vm161_vm2, 1, %v420_v2 }
   0x6   :  { %370 = vmatprep.mubr.bf16.mxu0 %v38_v7  ;;  %v165_v12 = vsel %vm160_vm0, 1, %v420_v2 }
   0x7   :  { %357 = vmatpush3.bf16.msra.mxu0 %v389_v1  ;;  %170 = vperm.xlu0 %386, %v165_v12  }
   0x8   :  { %358 = vmatprep.subr.bf16.mxu0 %v390_v3 }
   0xb   :  { %359 = vmatpush3.bf16.msra.mxu0 %v390_v3 }
   0xc   :  { %360 = vmatprep.subr.bf16.mxu0 %v391_v4 }
   0xd   :  { %14 = vsyncpa [#allocation3], 0  ;;  %v168_v16 = vsel %vm163_vm3, 1, %v420_v2  ;;  %v393_v17 = vld [vmem:[%s573_s2 + $0x10] sm:$0xff]   ;;  %173 = vperm.xlu0 %386, %v166_v15   ;;  %v394_v18 = vld [vmem:[%s573_s2 + $0x8] sm:$0xff]   ;;  %vm220_vm8 = vcmask 261120  }
   0xe   :  { %179 = vperm.xlu1 %387, %v168_v16   ;;  %v395_v19 = vld [vmem:[%s573_s2] sm:$0xff]   ;;  %v32_v20 = vld [vmem:[%s571_s0 + $0x10] sm:$0xff]  ;;  %v33_v21 = vld [vmem:[%s571_s0 + $0x18] sm:$0xff] }
   0xf   :  { %361 = vmatpush3.bf16.msra.mxu0 %v391_v4  ;;  %v39_v22 = vpack.c.bf16 %v33_v21, %v32_v20  ;;  %v396_v23 = vld [vmem:[%s576_s5 + $0x8] sm:$0xff]   ;;  %v397_v24 = vld [vmem:[%s576_s5] sm:$0xff]  }
  0x10   :  { %362 = vmatprep.subr.bf16.mxu0 %v392_v14  ;;  %374 = vmatprep.subr.bf16.mxu1 %v396_v23  ;;  %v325_v30 = vld [vmem:[%s574_s3] ss:$0 sm:$0xff] }
  0x11   :  { %375 = vmatpush3.bf16.msra.mxu1 %v396_v23  ;;  %v334_v37 = vld [vmem:[%s575_s4] ss:$0 sm:$0xff]  ;;  %s421_s4 = smov [#allocation2]  }
  0x12   :  { %376 = vmatprep.subr.bf16.mxu1 %v397_v24  ;;  %v335_v45 = vld [vmem:[%s577_s6] ss:$0 sm:$0xff]  ;;  %s310_s6 = sshll.u32 %s421_s4, 4  ;;  %s311_s6 = int_to_ptr.vmem [resolvable:$true] %s310_s6 }
  0x13   :  { %363 = vmatpush3.bf16.msra.mxu0 %v392_v14  ;;  %s398_s20 = scalar_lea.vmem %s311_s6, 512  ;;  %p403_p1 = scmp.lt.s32.totalorder %s311_s6, %s311_s6 }
  0x14   :  { %364 = vmatprep.subr.bf16.mxu0 %v393_v17  ;;  %p399_p0 = scmp.ne.s32.totalorder %s311_s6, %s398_s20  ;;  %p404_p2 = scmp.lt.s32.totalorder %s398_s20, %s398_s20 }
  0x15   :  { %377 = vmatpush3.bf16.msra.mxu1 %v397_v24 }
  0x16   :  { %p405_p3 = por %p404_p2, %p403_p1 }
  0x17   :  { %365 = vmatpush3.bf16.msra.mxu0 %v393_v17 }
  0x18   :  { %366 = vmatprep.subr.bf16.mxu0 %v394_v18  ;;  %p406_p4 = pnand %p405_p3, %p399_p0 }
  0x1b   :  { %367 = vmatpush3.bf16.msra.mxu0 %v394_v18 }
  0x1c   :  { %368 = vmatprep.subr.bf16.mxu0 %v395_v19 }
  0x1f   :  { %369 = vmatpush3.bf16.msra.mxu0 %v395_v19 }
  0x22   :  { %371 = vmatmul.mubr.bf16.vlgmr.msra.gmra.mxu0 %v39_v22 }
  0x80   :  { %v177_v25 = vpop.permute.xlu1 %176 }
  0x81   :  { %vm183_vm6 = vcmp.eq.s32.totalorder %v177_v25, 1 }
  0x82   :  { %v171_v26 = vpop.permute.xlu0 %170 }
  0x83   :  { %vm181_vm5 = vcmp.eq.s32.totalorder %v171_v26, 1 }
  0x88   :  { %v174_v33 = vpop.permute.xlu0 %173 }
  0x89   :  { %v180_v29 = vpop.permute.xlu1 %179  ;;  %vm182_vm7 = vcmp.eq.s32.totalorder %v174_v33, 1 }
  0x8a   :  { %vm184_vm4 = vcmp.eq.s32.totalorder %v180_v29, 1 }
  0xe2   :  { %v372_v27 = vpop.f32.mrf.mxu0 }
  0xe3   :  { %v154_v35 = vadd.f32 %v372_v27, %v325_v30 }
  0xe4   :  { %v145_v28 = vpop.f32.mrf.mxu0 }
  0xe5   :  { %v146_v32 = vadd.f32 %v325_v30, %v145_v28  ;;  %v193_v42 = vsel %vm183_vm6, %v334_v37, %v154_v35 }
  0xe6   :  { %v373_v31 = vpop.f32.mrf.mxu0 }
  0xe7   :  { %v157_v34 = vadd.f32 %v373_v31, %v325_v30  ;;  %v191_v40 = vsel %vm181_vm5, %v334_v37, %v146_v32 }
  0xe8   :  { %v148_v36 = vpop.f32.mrf.mxu0 }
  0xe9   :  { %v149_v38 = vadd.f32 %v325_v30, %v148_v36  ;;  %v194_v39 = vsel %vm184_vm4, %v334_v37, %v157_v34 }
  0xea   :  { %v196_v44 = vpack.c.bf16 %v194_v39, %v193_v42 }
  0xeb   :  { %v192_v41 = vsel %vm182_vm7, %v334_v37, %v149_v38 }
  0xec   :  { %v195_v43 = vpack.c.bf16 %v192_v41, %v191_v40 }
  0xee   :  { %378 = vmatprep.mubr.msk.bf16.mxu1 %vm220_vm8, %v195_v43 }
  0xef   :  { %379 = vmatmul.mubr.msk.bf16.vlgmr.msra.gmra.mxu1 %vm220_vm8, %v196_v44 }
 0x1af   :  { %v380_v46 = vpop.f32.mrf.mxu1 }
 0x1b0   :  { %v270_v47 = vadd.f32 %v380_v46, %v335_v45 }
 0x1b1   :  { %v261_v48 = vpop.f32.mrf.mxu1 }
 0x1b2   :  { %278 = vst [vmem:[#allocation2 + $0x10] sm:$0xff] %v270_v47  ;;  %v262_v49 = vadd.f32 %v335_v45, %v261_v48  ;;  %v282_v56 = vsub.f32 %v32_v20, %v270_v47 }
 0x1b3   :  { %v381_v50 = vpop.f32.mrf.mxu1 }
 0x1b4   :  { %276 = vst [vmem:[#allocation2] sm:$0xff] %v262_v49  ;;  %v273_v51 = vadd.f32 %v381_v50, %v335_v45  ;;  %v280_v52 = vsub.f32 %v484_v5, %v262_v49  ;;  %v286_v59 = vand.u32 2147483647, %v282_v56 }
 0x1b5   :  { %v264_v53 = vpop.f32.mrf.mxu1 }
 0x1b6   :  { %279 = vst [vmem:[#allocation2 + $0x18] sm:$0xff] %v273_v51  ;;  %v265_v54 = vadd.f32 %v335_v45, %v264_v53  ;;  %v284_v55 = vand.u32 2147483647, %v280_v52  ;;  %v283_v60 = vsub.f32 %v33_v21, %v273_v51 }
 0x1b8   :  { %277 = vst [vmem:[#allocation2 + $0x8] sm:$0xff] %v265_v54  ;;  %288 = vadd.xlane.f32.xlu0 %v284_v55  ;;  %v281_v57 = vsub.f32 %v489_v6, %v265_v54  ;;  %v287_v61 = vand.u32 2147483647, %v283_v60 }
 0x1ba   :  { %v285_v58 = vand.u32 2147483647, %v281_v57 }
 0x1bc   :  { %290 = vadd.xlane.f32.xlu1 %v285_v58  ;;  %292 = vadd.xlane.f32.xlu0 %v286_v59 }
 0x1c0   :  { %294 = vadd.xlane.f32.xlu0 %v287_v61 }
 0x1c1   :  { %409 = shalt.err (!%p406_p4)
}
 0x1c2   :  { %s422_s21 = smov 128   ;;  %s423_s22 = smov 8   ;;  %vm300_vm9 = vcmask 7168  }
 0x1c3   :  { %316 = dma.vmem_to_hbm [thread:$0]  %s311_s6, 512, %s578_s7, [#allocation3], %s422_s21, %s422_s21, %s423_s22  }
 0x241   :  { %v289_v62 = vpop.xlane.xlu0 %288 }
 0x242   :  { %v296_v63 = vmul.f32 %v289_v62, %v496_v8 }
 0x244   :  { %301 = vst.msk [vmem:[%s579_s8] sm:$0xff] %vm300_vm9, %v296_v63 }
 0x245   :  { %v291_v0 = vpop.xlane.xlu1 %290  ;;  %v293_v1 = vpop.xlane.xlu0 %292 }
 0x246   :  { %v297_v2 = vmul.f32 %v291_v0, %v508_v10  ;;  %v298_v3 = vmul.f32 %v293_v1, %v501_v9 }
 0x248   :  { %302 = vst.msk [vmem:[%s579_s8 + $0x8] sm:$0xff] %vm300_vm9, %v297_v2  ;;  %303 = vst.msk [vmem:[%s579_s8 + $0x10] sm:$0xff] %vm300_vm9, %v298_v3 }
 0x249   :  { %v295_v4 = vpop.xlane.xlu0 %294 }
 0x24a   :  { %v299_v5 = vmul.f32 %v295_v4, %v513_v11 }
 0x24c   :  { %304 = vst.msk [vmem:[%s579_s8 + $0x18] sm:$0xff] %vm300_vm9, %v299_v5 }
 0x24d   :  { %418 = dma.done.wait [#allocation3], 512  }
 0x24e   :  { %419 = vsyncadd [#allocation3], 4294966784 }
 0x24f   :  { %324 = vsyncpa [#allocation3], 1 }

</bundles_post_ra>
